<compile_context>
chip_gen: v5e
topology: v5e:2x2
jax: 0.10.0
libtpu: 0.0.40
codegen_flags: <defaults>
</compile_context>

<pallas_src>
import functools

import jax
import jax.numpy as jnp
from jax import lax
from jax.experimental import pallas as pl
from jax.experimental.pallas import tpu as pltpu


# ---------------------------------------------------------------------------
# One-shot row-normalization pass (matches F.cosine_similarity eps clamp).
# ---------------------------------------------------------------------------
def _normalize_kernel(xi_ref, xj_ref, oi_ref, oj_ref):
    def norm(x):
        x = x.astype(jnp.float32)
        ss = jnp.sum(x * x, axis=-1, keepdims=True)
        # ||x|| clamped at 1e-8  ->  ss clamped at 1e-16
        return x * lax.rsqrt(jnp.maximum(ss, 1e-16))

    oi_ref[...] = norm(xi_ref[...]).astype(oi_ref.dtype)
    oj_ref[...] = norm(xj_ref[...]).astype(oj_ref.dtype)


def _normalize(emb_i, emb_j, out_dtype, block_rows=256):
    B, D = emb_i.shape
    tb = _fit_block(block_rows, B)
    return pl.pallas_call(
        _normalize_kernel,
        out_shape=(jax.ShapeDtypeStruct((B, D), out_dtype),
                   jax.ShapeDtypeStruct((B, D), out_dtype)),
        grid_spec=pltpu.PrefetchScalarGridSpec(
            num_scalar_prefetch=0,
            grid=(B // tb,),
            in_specs=[pl.BlockSpec((tb, D), lambda i: (i, 0)),
                      pl.BlockSpec((tb, D), lambda i: (i, 0))],
            out_specs=(pl.BlockSpec((tb, D), lambda i: (i, 0)),
                       pl.BlockSpec((tb, D), lambda i: (i, 0))),
        ),
        compiler_params=pltpu.CompilerParams(
            dimension_semantics=("parallel",),
            vmem_limit_bytes=48 * 1024 * 1024),
    )(emb_i, emb_j)


# ---------------------------------------------------------------------------
# Main flash-style NT-Xent kernel.
# ---------------------------------------------------------------------------
def _usc_loss_kernel(ri_ref, rj_ref, ci_ref, cj_ref, out_ref,
                     di_acc, dj_acc, *, inv_temp):
    """One (row-block i, col-block k) step over the (2B x 2B) similarity matrix.

    ri / rj : (TM, D) pre-normalized row tiles of emb_i / emb_j (positive pairs).
    ci / cj : (TK, D) pre-normalized column tiles of emb_i / emb_j.
    out     : (TM, 1) combined per-row loss  log(d_i) + log(d_j) - 2*pos/T.
    di / dj : (TM, 1) VMEM running exp-row-sums across column blocks.
    """
    k = pl.program_id(1)
    last_k = pl.num_programs(1) - 1

    ri = ri_ref[...]
    rj = rj_ref[...]
    ci = ci_ref[...]
    cj = cj_ref[...]

    dn = (((1,), (1,)), ((), ()))   # contract on the feature axis (no transpose)

    def exp_rowsum(a, b):
        s = lax.dot_general(a, b, dn, preferred_element_type=jnp.float32)
        return jnp.sum(jnp.exp(s * inv_temp), axis=1, keepdims=True)

    # Sequential quadrant processing: dot -> exp -> reduce, one tile at a time.
    part_i = exp_rowsum(ri, ci)
    part_i = part_i + exp_rowsum(ri, cj)
    part_j = exp_rowsum(rj, ci)
    part_j = part_j + exp_rowsum(rj, cj)

    @pl.when(k == 0)
    def _():
        di_acc[...] = part_i
        dj_acc[...] = part_j

    @pl.when(k > 0)
    def _():
        di_acc[...] += part_i
        dj_acc[...] += part_j

    @pl.when(k == last_k)
    def _():
        # diag / pos from the SAME (possibly bf16) vectors that fed the MXU,
        # accumulated in f32, so the self-term subtraction cancels exactly.
        ri_f = ri.astype(jnp.float32)
        rj_f = rj.astype(jnp.float32)
        diag_i = jnp.sum(ri_f * ri_f, axis=-1, keepdims=True)
        diag_j = jnp.sum(rj_f * rj_f, axis=-1, keepdims=True)
        pos = jnp.sum(ri_f * rj_f, axis=-1, keepdims=True)
        denom_i = di_acc[...] - jnp.exp(diag_i * inv_temp)
        denom_j = dj_acc[...] - jnp.exp(diag_j * inv_temp)
        out_ref[...] = (jnp.log(denom_i) + jnp.log(denom_j)
                        - 2.0 * pos * inv_temp)


def _fit_block(requested, dim):
    """Largest divisor of `dim` that is <= requested and a multiple of 8.

    Falls back to the full extent only if no such divisor exists (full extent
    is always layout-legal)."""
    blk = min(int(requested), dim)
    if blk >= dim:
        return dim
    for c in range(blk, 7, -1):
        if dim % c == 0 and c % 8 == 0:
            return c
    return dim


def usc_loss(emb_i, emb_j, *, temperature=0.5, batch_size=None,
             block_rows=512, block_cols=512, use_bf16_matmul=True):
    """Pallas implementation of UscLoss.forward. Returns a scalar float32."""
    B, D = emb_i.shape
    assert emb_j.shape == (B, D)
    if batch_size is None:
        batch_size = B
    # No row-max shift: |cosine sim| <= 1, so exp(sim/T) stays finite in f32
    # only for T above ~1/88.  Enforce the documented lower bound.
    if float(temperature) < 0.0115:
        raise ValueError("usc_loss: temperature < ~0.0115 would overflow "
                         "float32 in exp(sim/T); add a max-shift if needed.")

    store_dtype = jnp.bfloat16 if use_bf16_matmul else jnp.float32
    ni, nj = _normalize(emb_i, emb_j, store_dtype)

    tm = _fit_block(block_rows, B)
    # Keep >= 2 row blocks when possible so the "parallel" axis can feed both
    # v7x TensorCores (costs at most one extra column-stream pass elsewhere).
    if B // tm < 2 and B >= 16:
        tm2 = _fit_block(B // 2, B)
        if 8 <= tm2 < tm:
            tm = tm2
    tk = _fit_block(block_cols, B)
    grid = (B // tm, B // tk)

    kernel = functools.partial(_usc_loss_kernel, inv_temp=1.0 / float(temperature))

    row_losses = pl.pallas_call(
        kernel,
        out_shape=jax.ShapeDtypeStruct((B, 1), jnp.float32),
        grid_spec=pltpu.PrefetchScalarGridSpec(
            num_scalar_prefetch=0,
            grid=grid,
            in_specs=[
                pl.BlockSpec((tm, D), lambda i, k: (i, 0)),   # emb_i row tile
                pl.BlockSpec((tm, D), lambda i, k: (i, 0)),   # emb_j row tile
                pl.BlockSpec((tk, D), lambda i, k: (k, 0)),   # emb_i col tile
                pl.BlockSpec((tk, D), lambda i, k: (k, 0)),   # emb_j col tile
            ],
            out_specs=pl.BlockSpec((tm, 1), lambda i, k: (i, 0)),
            scratch_shapes=[
                pltpu.VMEM((tm, 1), jnp.float32),
                pltpu.VMEM((tm, 1), jnp.float32),
            ],
        ),
        compiler_params=pltpu.CompilerParams(
            dimension_semantics=("parallel", "arbitrary"),
            vmem_limit_bytes=48 * 1024 * 1024),
    )(ni, nj, ni, nj)

    # Tiny O(B) final scalar reduction of the per-row losses (plain XLA).
    return jnp.sum(row_losses) / (2.0 * batch_size)


# ---------------------------------------------------------------------------
# Plain-JAX reference mirroring the PyTorch forward.
# ---------------------------------------------------------------------------
def _usc_loss_ref(emb_i, emb_j, temperature=0.5, batch_size=None):
    B = emb_i.shape[0]
    if batch_size is None:
        batch_size = B
    reps = jnp.concatenate([emb_i, emb_j], axis=0).astype(jnp.float32)
    norm = jnp.maximum(jnp.linalg.norm(reps, axis=-1, keepdims=True), 1e-8)
    reps_n = reps / norm
    sim = reps_n @ reps_n.T
    N = 2 * B
    neg_mask = 1.0 - jnp.eye(N, dtype=jnp.float32)
    sim_ij = jnp.diagonal(sim, offset=B)
    sim_ji = jnp.diagonal(sim, offset=-B)
    positives = jnp.concatenate([sim_ij, sim_ji], axis=0)
    nominator = jnp.exp(positives / temperature)
    denominator = jnp.sum(neg_mask * jnp.exp(sim / temperature), axis=1)
    loss_partial = -jnp.log(nominator / denominator)
    return jnp.sum(loss_partial) / (2.0 * batch_size)


if __name__ == "__main__":
    B, D = 8, 32  # small shapes: batch=8, hidden=32
    key = jax.random.PRNGKey(0)
    k1, k2 = jax.random.split(key)
    emb_i = jax.random.normal(k1, (B, D), dtype=jnp.float32)
    emb_j = jax.random.normal(k2, (B, D), dtype=jnp.float32)

    ref = _usc_loss_ref(emb_i, emb_j, temperature=0.5, batch_size=B)

    # Default path: bf16 MXU inputs, f32 accumulation.
    loss_bf16 = jax.block_until_ready(
        usc_loss(emb_i, emb_j, temperature=0.5, batch_size=B))
    assert jnp.allclose(loss_bf16, ref, rtol=2e-2, atol=2e-2), (loss_bf16, ref)

    # f32 path stays bit-close to the reference.
    loss_f32 = jax.block_until_ready(
        usc_loss(emb_i, emb_j, temperature=0.5, batch_size=B,
                 use_bf16_matmul=False))
    assert jnp.allclose(loss_f32, ref, rtol=1e-4, atol=1e-5), (loss_f32, ref)

    print("KERNEL_OK")
</pallas_src>

<mosaic_0001>
module attributes {stable_mosaic.version = 11 : i64} {
  func.func @_normalize_kernel(%arg0: i32, %arg1: memref<8x32xf32, #tpu.memory_space<vmem>>, %arg2: memref<8x32xf32, #tpu.memory_space<vmem>>, %arg3: memref<8x32xbf16, #tpu.memory_space<vmem>>, %arg4: memref<8x32xbf16, #tpu.memory_space<vmem>>) attributes {dimension_semantics = [#tpu.dimension_semantics<parallel>], iteration_bounds = array<i64: 1>, scalar_prefetch = 0 : i64, scratch_operands = 0 : i64, tpu.core_type = #tpu.core_type<tc>, window_params = [{transform_indices = @transform_0, window_bounds = array<i64: 8, 32>}, {transform_indices = @transform_1, window_bounds = array<i64: 8, 32>}, {transform_indices = @transform_2, window_bounds = array<i64: 8, 32>}, {transform_indices = @transform_3, window_bounds = array<i64: 8, 32>}]} {
    %c0 = arith.constant 0 : index
    %c0_0 = arith.constant 0 : index
    %0 = vector.load %arg1[%c0, %c0_0] : memref<8x32xf32, #tpu.memory_space<vmem>>, vector<8x32xf32>
    %1 = arith.mulf %0, %0 : vector<8x32xf32>
    %cst = arith.constant dense<0.000000e+00> : vector<8xf32>
    %2 = vector.multi_reduction <add>, %1, %cst [1] : vector<8x32xf32> to vector<8xf32>
    %3 = vector.shape_cast %2 : vector<8xf32> to vector<8x1xf32>
    %cst_1 = arith.constant 1.000000e-16 : f32
    %4 = vector.broadcast %cst_1 : f32 to vector<8x1xf32>
    %5 = arith.maximumf %3, %4 : vector<8x1xf32>
    %6 = math.rsqrt %5 : vector<8x1xf32>
    %7 = vector.broadcast %6 : vector<8x1xf32> to vector<8x32xf32>
    %8 = arith.mulf %0, %7 : vector<8x32xf32>
    %9 = arith.truncf %8 : vector<8x32xf32> to vector<8x32xbf16>
    %c0_2 = arith.constant 0 : index
    %c0_3 = arith.constant 0 : index
    %10 = vector.load %arg3[%c0_2, %c0_3] : memref<8x32xbf16, #tpu.memory_space<vmem>>, vector<8x32xbf16>
    tpu.vector_store %arg3[%c0_2, %c0_3], %9 {strides = array<i32>} : memref<8x32xbf16, #tpu.memory_space<vmem>>, vector<8x32xbf16>,
    %c0_4 = arith.constant 0 : index
    %c0_5 = arith.constant 0 : index
    %11 = vector.load %arg2[%c0_4, %c0_5] : memref<8x32xf32, #tpu.memory_space<vmem>>, vector<8x32xf32>
    %12 = arith.mulf %11, %11 : vector<8x32xf32>
    %cst_6 = arith.constant dense<0.000000e+00> : vector<8xf32>
    %13 = vector.multi_reduction <add>, %12, %cst_6 [1] : vector<8x32xf32> to vector<8xf32>
    %14 = vector.shape_cast %13 : vector<8xf32> to vector<8x1xf32>
    %cst_7 = arith.constant 1.000000e-16 : f32
    %15 = vector.broadcast %cst_7 : f32 to vector<8x1xf32>
    %16 = arith.maximumf %14, %15 : vector<8x1xf32>
    %17 = math.rsqrt %16 : vector<8x1xf32>
    %18 = vector.broadcast %17 : vector<8x1xf32> to vector<8x32xf32>
    %19 = arith.mulf %11, %18 : vector<8x32xf32>
    %20 = arith.truncf %19 : vector<8x32xf32> to vector<8x32xbf16>
    %c0_8 = arith.constant 0 : index
    %c0_9 = arith.constant 0 : index
    %21 = vector.load %arg4[%c0_8, %c0_9] : memref<8x32xbf16, #tpu.memory_space<vmem>>, vector<8x32xbf16>
    tpu.vector_store %arg4[%c0_8, %c0_9], %20 {strides = array<i32>} : memref<8x32xbf16, #tpu.memory_space<vmem>>, vector<8x32xbf16>,
    return
  }
  func.func @transform_0(%arg0: i32) -> (i32, i32) {
    %c0_i32 = arith.constant 0 : i32
    %c0_i32_0 = arith.constant 0 : i32
    return %arg0, %c0_i32 : i32, i32
  }
  func.func @transform_1(%arg0: i32) -> (i32, i32) {
    %c0_i32 = arith.constant 0 : i32
    %c0_i32_0 = arith.constant 0 : i32
    return %arg0, %c0_i32 : i32, i32
  }
  func.func @transform_2(%arg0: i32) -> (i32, i32) {
    %c0_i32 = arith.constant 0 : i32
    %c0_i32_0 = arith.constant 0 : i32
    return %arg0, %c0_i32 : i32, i32
  }
  func.func @transform_3(%arg0: i32) -> (i32, i32) {
    %c0_i32 = arith.constant 0 : i32
    %c0_i32_0 = arith.constant 0 : i32
    return %arg0, %c0_i32 : i32, i32
  }
}

</mosaic_0001>

<bundles_post_ra>
// kernel: tpu_custom_call.1
= control target key start
LH: loop header
LB: loop body
LE: loop exit
PB: predicated region body
PF: predicated region fallthrough
CT: control target
= control target key end

     0   :  { %9 = vsyncpa [#allocation3], 0  ;;  %s267_s0 = inlined_call_operand.hbm [shape: f32[8,32], index: 0, kind: input, shape index: {}]   ;;  %s268_s1 = inlined_call_operand.hbm [shape: f32[8,32], index: 1, kind: input, shape index: {}]   ;;  %s269_s2 = inlined_call_operand.hbm [shape: bf16[8,32], index: 2, kind: output, shape index: {0}]   ;;  %s270_s3 = inlined_call_operand.hbm [shape: bf16[8,32], index: 3, kind: output, shape index: {1}]  }
   0x1   :  { %10 = vsyncpa [#allocation6], 0 }
   0x2   :  { %11 = vsyncpa [#allocation4], 0 }
   0x3   :  { %12 = vsyncpa [#allocation9], 0  ;;  %s18_s14 = sshll.u32 %s267_s0, 4  ;;  %s229_s15 = smov [#allocation2]   ;;  %s19_s14 = int_to_ptr.hbm [resolvable:$true] %s18_s14 }
   0x4   :  { %s20_s16 = sshll.u32 %s229_s15, 4  ;;  %s29_s19 = sshll.u32 %s268_s1, 4  ;;  %s21_s16 = int_to_ptr.vmem [resolvable:$true] %s20_s16  ;;  %s30_s19 = int_to_ptr.hbm [resolvable:$true] %s29_s19 }
   0x5   :  { %23 = dma.hbm_to_vmem [thread:$0]  %s19_s14, 128, %s21_s16, [#allocation3]  }
   0x6   :  { %s230_s20 = smov [#allocation5]  }
   0x7   :  { %s31_s21 = sshll.u32 %s230_s20, 4  ;;  %s32_s21 = int_to_ptr.vmem [resolvable:$true] %s31_s21 }
   0x8   :  { %34 = dma.hbm_to_vmem [thread:$0]  %s30_s19, 128, %s32_s21, [#allocation6]  }
   0x9   :  { %221 = dma.done.wait [#allocation3], 128  }
   0xa   :  { %222 = vsyncadd [#allocation3], 4294967168 }
   0xb   :  { %223 = dma.done.wait [#allocation6], 128  }
   0xc   :  { %224 = vsyncadd [#allocation6], 4294967168  ;;  %v43_v0 = vld [vmem:[#allocation2] sm:$0xff]  ;;  %vm45_vm0 = vcmask 261120   ;;  %v64_v2 = vld [vmem:[#allocation5] sm:$0xff]  ;;  %s231_s0 = smov [#allocation7]  }
   0xd   :  { %v44_v1 = vmul.f32 %v43_v0, %v43_v0  ;;  %v65_v4 = vmul.f32 %v64_v2, %v64_v2  ;;  %s88_s1 = sshll.u32 %s231_s0, 4  ;;  %s90_s24 = sshll.u32 %s269_s2, 4  ;;  %vm62_vm4 = vcmask 257024   ;;  %s89_s1 = int_to_ptr.vmem [resolvable:$true] %s88_s1  ;;  %s91_s24 = int_to_ptr.hbm [resolvable:$true] %s90_s24 }
   0xe   :  { %s232_s25 = smov [#allocation8]   ;;  %s101_s2 = sshll.u32 %s270_s3, 4  ;;  %s102_s2 = int_to_ptr.hbm [resolvable:$true] %s101_s2 }
   0xf   :  { %v46_v3 = vsel %vm45_vm0, %v44_v1, 0.0  ;;  %v66_v5 = vsel %vm45_vm0, %v65_v4, 0.0  ;;  %s99_s26 = sshll.u32 %s232_s25, 4  ;;  %s100_s26 = int_to_ptr.vmem [resolvable:$true] %s99_s26 }
  0x10   :  { %47 = vadd.xlane.f32.xlu0 %v46_v3 }
  0x18   :  { %67 = vadd.xlane.f32.xlu0 %v66_v5 }
  0x83   :  { %v48_v6 = vpop.xlane.xlu0 %47 }
  0x84   :  { %v49_v7 = vmax.f32 %v48_v6, 1e-16 }
  0x86   :  { %121 = vrsqrt.f32 %v49_v7  ;;  %vm56_vm2 = vweird.f32 %v49_v7 }
  0x8b   :  { %v68_v8 = vpop.xlane.xlu0 %67 }
  0x8c   :  { %v122_v9 = vpop.eup %121  ;;  %v69_v10 = vmax.f32 %v68_v8, 1e-16 }
  0x8d   :  { %v51_v11 = vmul.f32 %v122_v9, %v49_v7  ;;  %vm57_vm1 = vweird.f32 %v122_v9 }
  0x8e   :  { %123 = vrsqrt.f32 %v69_v10  ;;  %vm58_vm3 = vmor %vm56_vm2, %vm57_vm1  ;;  %vm76_vm6 = vweird.f32 %v69_v10 }
  0x8f   :  { %v52_v12 = vmul.f32 %v122_v9, %v51_v11 }
  0x91   :  { %v53_v13 = vmul.f32 0.5, %v52_v12 }
  0x93   :  { %v54_v14 = vsub.f32 1.5, %v53_v13 }
  0x94   :  { %v124_v15 = vpop.eup %123 }
  0x95   :  { %v55_v16 = vmul.f32 %v122_v9, %v54_v14  ;;  %v71_v17 = vmul.f32 %v124_v15, %v69_v10  ;;  %vm77_vm5 = vweird.f32 %v124_v15 }
  0x96   :  { %vm78_vm7 = vmor %vm76_vm6, %vm77_vm5 }
  0x97   :  { %v59_v18 = vsel %vm58_vm3, %v122_v9, %v55_v16  ;;  %v72_v19 = vmul.f32 %v124_v15, %v71_v17 }
  0x98   :  { %v60_v20 = vmul.f32 %v59_v18, %v43_v0 }
  0x99   :  { %v73_v21 = vmul.f32 0.5, %v72_v19 }
  0x9a   :  { %v61_v22 = vpack.c.bf16 %v60_v20, %v60_v20 }
  0x9b   :  { %v74_v23 = vsub.f32 1.5, %v73_v21 }
  0x9c   :  { %63 = vst.msk [vmem:[#allocation7] sm:$0xf] %vm62_vm4, %v61_v22 }
  0x9d   :  { %v75_v24 = vmul.f32 %v124_v15, %v74_v23  ;;  %93 = dma.vmem_to_hbm [thread:$0]  %s89_s1, 64, %s91_s24, [#allocation4]  }
  0x9f   :  { %v79_v25 = vsel %vm78_vm7, %v124_v15, %v75_v24 }
  0xa0   :  { %v80_v26 = vmul.f32 %v79_v25, %v64_v2 }
  0xa2   :  { %v81_v27 = vpack.c.bf16 %v80_v26, %v80_v26 }
  0xa4   :  { %82 = vst.msk [vmem:[#allocation8] sm:$0xf] %vm62_vm4, %v81_v27 }
  0xa5   :  { %104 = dma.vmem_to_hbm [thread:$0]  %s100_s26, 64, %s102_s2, [#allocation9]  }
  0xa6   :  { %225 = dma.done.wait [#allocation4], 64  }
  0xa7   :  { %226 = vsyncadd [#allocation4], 4294967232 }
  0xa8   :  { %227 = dma.done.wait [#allocation9], 64  }
  0xa9   :  { %228 = vsyncadd [#allocation9], 4294967232 }
  0xaa   :  { %113 = vsyncpa [#allocation3], 1 }
  0xab   :  { %114 = vsyncpa [#allocation6], 1 }
  0xac   :  { %115 = vsyncpa [#allocation4], 1 }
  0xad   :  { %116 = vsyncpa [#allocation9], 1 }

</bundles_post_ra>
